<compile_context>
chip_gen: v7x
topology: tpu7x:2x2x1
jax: 0.10.0
libtpu: 0.0.40
codegen_flags: <defaults>
</compile_context>

<pallas_src>
import functools

import jax
import jax.numpy as jnp
from jax import lax
from jax.experimental import pallas as pl
from jax.experimental.pallas import tpu as pltpu


def mlp_critic_kernel(obs_ref, w1_ref, b1_ref, w2_ref, b2_ref, w3_ref, b3_ref,
                      out_ref, *, tanh_bf16):
    """Fused 3-layer MLP in batch-on-lanes layout.

    obs_ref : [TILE_B, obs_dim]  (input dtype, cast to bf16 in-kernel)
    w1_ref  : [h1, obs_dim] bf16   b1_ref : [h1, 1] f32
    w2_ref  : [h2, h1]      bf16   b2_ref : [h2, 1] f32
    w3_ref  : [1, h2]       bf16   b3_ref : (1, 1)  f32 (SMEM)
    out_ref : [1, TILE_B]   f32
    """
    x = obs_ref[...].astype(jnp.bfloat16)                     # [TILE_B, obs_dim]

    # Layer 1: contract obs on its last dim (W1 @ obs^T) -> [h1, TILE_B].
    h1 = lax.dot_general(w1_ref[...], x,
                         dimension_numbers=(((1,), (1,)), ((), ())),
                         preferred_element_type=jnp.float32)
    h1 = h1 + b1_ref[...]                                      # f32 bias add
    if tanh_bf16:
        h1 = jnp.tanh(h1.astype(jnp.bfloat16))                 # bf16 EUP tanh
    else:
        h1 = jnp.tanh(h1).astype(jnp.bfloat16)                 # f32 tanh (v5e)

    # Layer 2: [h2, h1] @ [h1, TILE_B] -> [h2, TILE_B]
    h2 = jnp.dot(w2_ref[...], h1, preferred_element_type=jnp.float32)
    h2 = h2 + b2_ref[...]
    if tanh_bf16:
        h2 = jnp.tanh(h2.astype(jnp.bfloat16))
    else:
        h2 = jnp.tanh(h2).astype(jnp.bfloat16)

    # Output layer: [1, h2] @ [h2, TILE_B] -> [1, TILE_B]  (lane-dense store)
    v = jnp.dot(w3_ref[...], h2, preferred_element_type=jnp.float32)
    out_ref[...] = (v + b3_ref[0, 0]).astype(out_ref.dtype)


def _round_up(x, m):
    return ((x + m - 1) // m) * m


def _device_kind():
    try:
        return jax.devices()[0].device_kind.lower()
    except Exception:
        return ""


def _pick_tile_b(B, *, cap, prefer_two_tiles):
    tb = min(cap, _round_up(max(B, 1), 128))
    if prefer_two_tiles and tb > 128 and _round_up(B, tb) // tb < 2:
        # Split the batch into >= 2 grid steps so a two-TensorCore chip (v7x)
        # can put one tile on each core.
        tb = max(128, _round_up(_round_up(B, 128) // 2, 128))
    return tb


def mlp_critic_forward(obs, params, *, tile_b=None):
    """Fused MLP critic. obs: [B, obs_dim] -> returns [B] (squeezed)."""
    (w1, b1), (w2, b2), (w3, b3) = params
    B, obs_dim = obs.shape
    h1 = w1.shape[1]
    h2 = w2.shape[1]

    kind = _device_kind()
    is_old_gen = any(v in kind for v in ("v2", "v3", "v4", "v5"))
    tanh_bf16 = not is_old_gen                 # bf16 tanh on v6e/v7x/newer only
    is_v7 = ("v7" in kind) or ("7x" in kind)

    if tile_b is None:
        # Big lane-dense batch tile (multiple of 128): amortizes the ~0.35us
        # per-grid-step overhead.  ~10 MiB of VMEM at 16384 columns, safe on
        # every generation; on v7x prefer >= 2 tiles for the two TensorCores.
        tile_b = _pick_tile_b(B, cap=16384, prefer_two_tiles=is_v7)
    assert tile_b % 128 == 0
    b_pad = _round_up(B, tile_b)
    num_tiles = b_pad // tile_b

    # obs stays in its natural [B, obs_dim] layout and dtype; pad only if the
    # batch does not divide the tile (no transpose / cast pass in the wrapper).
    obs_p = obs if b_pad == B else jnp.pad(obs, ((0, b_pad - B), (0, 0)))

    # Tiny weights: [out, in] bf16, VMEM-resident via constant index maps.
    w1t = w1.T.astype(jnp.bfloat16)                      # [h1, obs_dim]
    w2t = w2.T.astype(jnp.bfloat16)                      # [h2, h1]
    w3t = w3.T.astype(jnp.bfloat16)                      # [1, h2]
    b1c = b1.reshape(-1, 1).astype(jnp.float32)          # [h1, 1]
    b2c = b2.reshape(-1, 1).astype(jnp.float32)          # [h2, 1]
    b3s = b3.reshape(1, 1).astype(jnp.float32)           # (1, 1) -> SMEM

    weight_bytes = sum(int(a.size * a.dtype.itemsize)
                       for a in (w1t, w2t, w3t, b1c, b2c, b3s))
    cost = pl.CostEstimate(
        flops=int(2 * b_pad * (obs_dim * h1 + h1 * h2 + h2 * 1)),
        transcendentals=int(b_pad * (h1 + h2)),
        bytes_accessed=int(b_pad * obs_dim * obs_p.dtype.itemsize   # obs stream
                           + b_pad * 4                              # output
                           + num_tiles * weight_bytes),
    )

    kernel = functools.partial(mlp_critic_kernel, tanh_bf16=tanh_bf16)

    out = pl.pallas_call(
        kernel,
        out_shape=jax.ShapeDtypeStruct((1, b_pad), jnp.float32),
        grid=(num_tiles,),
        in_specs=[
            # Streamed obs, tiled along the batch (sublane) axis; kernel
            # contracts its last dim so outputs are lane-dense.
            pl.BlockSpec((tile_b, obs_dim), lambda i: (i, 0)),
            # Weights/biases: constant index maps -> resident across the grid.
            pl.BlockSpec(w1t.shape, lambda i: (0, 0)),
            pl.BlockSpec(b1c.shape, lambda i: (0, 0)),
            pl.BlockSpec(w2t.shape, lambda i: (0, 0)),
            pl.BlockSpec(b2c.shape, lambda i: (0, 0)),
            pl.BlockSpec(w3t.shape, lambda i: (0, 0)),
            # Scalar output bias via SMEM (avoids a padded (8,128) VMEM tile).
            pl.BlockSpec(memory_space=pltpu.MemorySpace.SMEM),
        ],
        out_specs=pl.BlockSpec((1, tile_b), lambda i: (0, i)),
        compiler_params=pltpu.CompilerParams(
            dimension_semantics=("parallel",),
            vmem_limit_bytes=32 * 1024 * 1024),
        cost_estimate=cost,
    )(obs_p, w1t, b1c, w2t, b2c, w3t, b3s)

    # torch.squeeze(v_net(obs), -1): drop batch padding and the singleton row.
    return out[0, :B]


def init_params(key, sizes):
    """Deterministic init mimicking nn.Linear (uniform +/- 1/sqrt(fan_in)).

    Weights stored [in, out], biases [1, out]."""
    params = []
    for j in range(len(sizes) - 1):
        fan_in, fan_out = sizes[j], sizes[j + 1]
        key, kw, kb = jax.random.split(key, 3)
        bound = 1.0 / jnp.sqrt(fan_in)
        w = jax.random.uniform(kw, (fan_in, fan_out), jnp.float32, -bound, bound)
        b = jax.random.uniform(kb, (1, fan_out), jnp.float32, -bound, bound)
        params.append((w, b))
    return params


def reference_forward(obs, params, *, tanh_bf16=False):
    """Pure-JAX reference matching MLPCritic.forward (Tanh hidden, Identity
    out), mirroring the kernel's bf16-matmul / f32-accumulate numerics."""
    x = obs
    n = len(params)
    for j, (w, b) in enumerate(params):
        x = jnp.dot(x.astype(jnp.bfloat16), w.astype(jnp.bfloat16),
                    preferred_element_type=jnp.float32) + b
        if j < n - 1:
            if tanh_bf16:
                x = jnp.tanh(x.astype(jnp.bfloat16)).astype(jnp.float32)
            else:
                x = jnp.tanh(x)
    return jnp.squeeze(x, axis=-1)


def reference_forward_f32(obs, params):
    """Straight f32 reference (matches the torch module up to f32 rounding)."""
    x = obs
    n = len(params)
    for j, (w, b) in enumerate(params):
        x = jnp.dot(x, w) + b
        if j < n - 1:
            x = jnp.tanh(x)
    return jnp.squeeze(x, axis=-1)


if __name__ == "__main__":
    # Small shapes consistent with the module: obs_dim=16, hidden_sizes=(32, 32).
    # NOTE: at this toy size fixed dispatch overhead dominates; the kernel is
    # designed for large-batch critic evaluation (B in the thousands).
    B, obs_dim = 8, 16
    hidden_sizes = (32, 32)
    sizes = [obs_dim] + list(hidden_sizes) + [1]

    key = jax.random.PRNGKey(0)
    key, k_obs = jax.random.split(key)
    obs = jax.random.normal(k_obs, (B, obs_dim), dtype=jnp.float32)

    params = init_params(jax.random.PRNGKey(1), sizes)

    v = mlp_critic_forward(obs, params)
    v = jax.block_until_ready(v)
    assert v.shape == (B,), f"unexpected output shape {v.shape}"

    # Tight check vs a reference that mirrors the kernel numerics.
    kind = _device_kind()
    tanh_bf16 = not any(g in kind for g in ("v2", "v3", "v4", "v5"))
    v_ref = reference_forward(obs, params, tanh_bf16=tanh_bf16)
    assert jnp.allclose(v, v_ref, atol=3e-2, rtol=3e-2), (
        f"mismatch vs mixed-precision reference: max abs err "
        f"{float(jnp.max(jnp.abs(v - v_ref)))}")

    # Loose semantic check vs the pure-f32 (torch-equivalent) forward.
    v_f32 = reference_forward_f32(obs, params)
    assert jnp.allclose(v, v_f32, atol=1e-1, rtol=1e-1), (
        f"mismatch vs f32 reference: max abs err "
        f"{float(jnp.max(jnp.abs(v - v_f32)))}")

    print("KERNEL_OK")
</pallas_src>

<mosaic_0001>
module attributes {stable_mosaic.version = 11 : i64} {
  func.func @mlp_critic_kernel(%arg0: i32, %arg1: memref<128x16xf32, #tpu.memory_space<vmem>>, %arg2: memref<32x16xbf16, #tpu.memory_space<vmem>>, %arg3: memref<32x1xf32, #tpu.memory_space<vmem>>, %arg4: memref<32x32xbf16, #tpu.memory_space<vmem>>, %arg5: memref<32x1xf32, #tpu.memory_space<vmem>>, %arg6: memref<1x32xbf16, #tpu.memory_space<vmem>>, %arg7: memref<1x1xf32, #tpu.memory_space<smem>>, %arg8: memref<1x128xf32, #tpu.memory_space<vmem>>) attributes {dimension_semantics = [#tpu.dimension_semantics<parallel>], iteration_bounds = array<i64: 1>, scalar_prefetch = 0 : i64, scratch_operands = 0 : i64, tpu.core_type = #tpu.core_type<tc>, window_params = [{transform_indices = @transform_0, window_bounds = array<i64: 128, 16>}, {pipeline_mode = #tpu.pipeline_mode<synchronous>, transform_indices = @transform_1, window_bounds = array<i64: 32, 16>}, {pipeline_mode = #tpu.pipeline_mode<synchronous>, transform_indices = @transform_2, window_bounds = array<i64: 32, 1>}, {pipeline_mode = #tpu.pipeline_mode<synchronous>, transform_indices = @transform_3, window_bounds = array<i64: 32, 32>}, {pipeline_mode = #tpu.pipeline_mode<synchronous>, transform_indices = @transform_4, window_bounds = array<i64: 32, 1>}, {pipeline_mode = #tpu.pipeline_mode<synchronous>, transform_indices = @transform_5, window_bounds = array<i64: 1, 32>}, {transform_indices = @transform_6, window_bounds = array<i64: 1, 1>}, {transform_indices = @transform_7, window_bounds = array<i64: 1, 128>}]} {
    %c0 = arith.constant 0 : index
    %c0_0 = arith.constant 0 : index
    %0 = vector.load %arg1[%c0, %c0_0] : memref<128x16xf32, #tpu.memory_space<vmem>>, vector<128x16xf32>
    %1 = arith.truncf %0 : vector<128x16xf32> to vector<128x16xbf16>
    %c0_1 = arith.constant 0 : index
    %c0_2 = arith.constant 0 : index
    %2 = vector.load %arg2[%c0_1, %c0_2] : memref<32x16xbf16, #tpu.memory_space<vmem>>, vector<32x16xbf16>
    %cst = arith.constant dense<0.000000e+00> : vector<32x128xf32>
    %3 = tpu.matmul %2, %1, %cst {dimension_numbers = #tpu.dot_dimension_numbers<[1], [1], [0], [0], [0, 0, 1, 0], [], []>} : vector<32x16xbf16>, vector<128x16xbf16>, vector<32x128xf32> -> vector<32x128xf32>
    %c0_3 = arith.constant 0 : index
    %c0_4 = arith.constant 0 : index
    %4 = vector.load %arg3[%c0_3, %c0_4] : memref<32x1xf32, #tpu.memory_space<vmem>>, vector<32x1xf32>
    %5 = vector.broadcast %4 : vector<32x1xf32> to vector<32x128xf32>
    %6 = arith.addf %3, %5 : vector<32x128xf32>
    %7 = arith.truncf %6 : vector<32x128xf32> to vector<32x128xbf16>
    %8 = math.tanh %7 : vector<32x128xbf16>
    %c0_5 = arith.constant 0 : index
    %c0_6 = arith.constant 0 : index
    %9 = vector.load %arg4[%c0_5, %c0_6] : memref<32x32xbf16, #tpu.memory_space<vmem>>, vector<32x32xbf16>
    %cst_7 = arith.constant dense<0.000000e+00> : vector<32x128xf32>
    %10 = tpu.matmul %9, %8, %cst_7 {dimension_numbers = #tpu.dot_dimension_numbers<[1], [0], [0], [1], [0, 0, 1, 1], [], []>} : vector<32x32xbf16>, vector<32x128xbf16>, vector<32x128xf32> -> vector<32x128xf32>
    %c0_8 = arith.constant 0 : index
    %c0_9 = arith.constant 0 : index
    %11 = vector.load %arg5[%c0_8, %c0_9] : memref<32x1xf32, #tpu.memory_space<vmem>>, vector<32x1xf32>
    %12 = vector.broadcast %11 : vector<32x1xf32> to vector<32x128xf32>
    %13 = arith.addf %10, %12 : vector<32x128xf32>
    %14 = arith.truncf %13 : vector<32x128xf32> to vector<32x128xbf16>
    %15 = math.tanh %14 : vector<32x128xbf16>
    %c0_10 = arith.constant 0 : index
    %c0_11 = arith.constant 0 : index
    %16 = vector.load %arg6[%c0_10, %c0_11] : memref<1x32xbf16, #tpu.memory_space<vmem>>, vector<1x32xbf16>
    %cst_12 = arith.constant dense<0.000000e+00> : vector<1x128xf32>
    %17 = tpu.matmul %16, %15, %cst_12 {dimension_numbers = #tpu.dot_dimension_numbers<[1], [0], [0], [1], [0, 0, 1, 1], [], []>} : vector<1x32xbf16>, vector<32x128xbf16>, vector<1x128xf32> -> vector<1x128xf32>
    %c0_13 = arith.constant 0 : index
    %c0_14 = arith.constant 0 : index
    %18 = memref.load %arg7[%c0_13, %c0_14] : memref<1x1xf32, #tpu.memory_space<smem>>
    %19 = vector.broadcast %18 : f32 to vector<1x128xf32>
    %20 = arith.addf %17, %19 : vector<1x128xf32>
    %c0_15 = arith.constant 0 : index
    %c0_16 = arith.constant 0 : index
    %21 = vector.load %arg8[%c0_15, %c0_16] : memref<1x128xf32, #tpu.memory_space<vmem>>, vector<1x128xf32>
    tpu.vector_store %arg8[%c0_15, %c0_16], %20 {strides = array<i32>} : memref<1x128xf32, #tpu.memory_space<vmem>>, vector<1x128xf32>,
    return
  }
  func.func @transform_0(%arg0: i32) -> (i32, i32) {
    %c0_i32 = arith.constant 0 : i32
    %c0_i32_0 = arith.constant 0 : i32
    return %arg0, %c0_i32 : i32, i32
  }
  func.func @transform_1(%arg0: i32) -> (i32, i32) {
    %c0_i32 = arith.constant 0 : i32
    %c0_i32_0 = arith.constant 0 : i32
    %c0_i32_1 = arith.constant 0 : i32
    return %c0_i32, %c0_i32_0 : i32, i32
  }
  func.func @transform_2(%arg0: i32) -> (i32, i32) {
    %c0_i32 = arith.constant 0 : i32
    %c0_i32_0 = arith.constant 0 : i32
    %c0_i32_1 = arith.constant 0 : i32
    return %c0_i32, %c0_i32_0 : i32, i32
  }
  func.func @transform_3(%arg0: i32) -> (i32, i32) {
    %c0_i32 = arith.constant 0 : i32
    %c0_i32_0 = arith.constant 0 : i32
    %c0_i32_1 = arith.constant 0 : i32
    return %c0_i32, %c0_i32_0 : i32, i32
  }
  func.func @transform_4(%arg0: i32) -> (i32, i32) {
    %c0_i32 = arith.constant 0 : i32
    %c0_i32_0 = arith.constant 0 : i32
    %c0_i32_1 = arith.constant 0 : i32
    return %c0_i32, %c0_i32_0 : i32, i32
  }
  func.func @transform_5(%arg0: i32) -> (i32, i32) {
    %c0_i32 = arith.constant 0 : i32
    %c0_i32_0 = arith.constant 0 : i32
    %c0_i32_1 = arith.constant 0 : i32
    return %c0_i32, %c0_i32_0 : i32, i32
  }
  func.func @transform_6(%arg0: i32) -> (i32, i32) {
    %c0_i32 = arith.constant 0 : i32
    %c0_i32_0 = arith.constant 0 : i32
    %c0_i32_1 = arith.constant 0 : i32
    return %c0_i32, %c0_i32_0 : i32, i32
  }
  func.func @transform_7(%arg0: i32) -> (i32, i32) {
    %c0_i32 = arith.constant 0 : i32
    %c0_i32_0 = arith.constant 0 : i32
    return %c0_i32, %arg0 : i32, i32
  }
}

</mosaic_0001>

<bundles_post_ra>
// kernel: tpu_custom_call.1
= control target key start
LH: loop header
LB: loop body
LE: loop exit
PB: predicated region body
PF: predicated region fallthrough
CT: control target
= control target key end

     0   :  { %vm91_vm0 = vcmask 130048   ;;  %v446_v5 = vmov 0   ;;  %s613_s0 = inlined_call_operand.vmem [shape: f32[128,16], index: 0, kind: input, shape index: {}]   ;;  %s614_s1 = inlined_call_operand.vmem [shape: bf16[32,16], index: 1, kind: input, shape index: {}]   ;;  %s615_s2 = inlined_call_operand.vmem [shape: f32[32,1], index: 2, kind: input, shape index: {}]   ;;  %s616_s3 = inlined_call_operand.vmem [shape: bf16[32,32], index: 3, kind: input, shape index: {}]   ;;  %s617_s4 = inlined_call_operand.vmem [shape: f32[32,1], index: 4, kind: input, shape index: {}]   ;;  %s618_s5 = inlined_call_operand.vmem [shape: bf16[1,32], index: 5, kind: input, shape index: {}]   ;;  %s619_s6 = inlined_call_operand.<no memory space> [shape: f32[1,1], index: 6, kind: input, shape index: {}]   ;;  %s620_s7 = inlined_call_operand.hbm [shape: f32[1,128], index: 7, kind: output, shape index: {}]  }
   0x1   :  { %v29_v0 = vld [vmem:[%s613_s0] sm:$0xff]  ;;  %v30_v1 = vld [vmem:[%s613_s0 + $0x8] sm:$0xff]  ;;  %v31_v2 = vld [vmem:[%s613_s0 + $0x10] sm:$0xff]  ;;  %408 = vset.pattern.permute.xlu0 %v446_v5  ;;  %409 = vset.pattern.permute.xlu1 %v446_v5 }
   0x2   :  { %v45_v3 = vpack.c.bf16 %v30_v1, %v29_v0  ;;  %v32_v4 = vld [vmem:[%s613_s0 + $0x18] sm:$0xff]  ;;  %v33_v8 = vld [vmem:[%s613_s0 + $0x20] sm:$0xff]  ;;  %v34_v9 = vld [vmem:[%s613_s0 + $0x28] sm:$0xff] }
   0x3   :  { %v46_v6 = vpack.c.bf16 %v32_v4, %v31_v2  ;;  %v410_v10 = vld [vmem:[%s614_s1] sm:$0xff]   ;;  %v59_v12 = vld [vmem:[%s615_s2 + $0x10] sm:$0xff]  ;;  %v47_v14 = vpack.c.bf16 %v34_v9, %v33_v8  ;;  %v58_v15 = vld [vmem:[%s615_s2 + $0x8] sm:$0xff] }
   0x4   :  { %396 = vmatprep.subr.msk.bf16.mxu0 %vm91_vm0, %v45_v3  ;;  %v99_v7 = vsel %vm91_vm0, %v45_v3, 0  ;;  %v57_v11 = vld [vmem:[%s615_s2] sm:$0xff]  ;;  %376 = vmatprep.mubr.msk.bf16.mxu0 %vm91_vm0, %v410_v10  ;;  %v60_v16 = vld [vmem:[%s615_s2 + $0x18] sm:$0xff] }
   0x5   :  { %361 = vmatpush3.bf16.xpose.msra.mxu0 %v99_v7  ;;  %63 = vperm.xlu0 %408, %v57_v11   ;;  %v102_v13 = vsel %vm91_vm0, %v46_v6, 0 }
   0x6   :  { %397 = vmatprep.subr.msk.bf16.mxu0 %vm91_vm0, %v46_v6  ;;  %73 = vperm.xlu1 %409, %v59_v12  }
   0x7   :  { %13 = vsyncpa [#allocation4], 0  ;;  %v179_v17 = vld [vmem:[%s617_s4] sm:$0xff]  ;;  %v35_v18 = vld [vmem:[%s613_s0 + $0x30] sm:$0xff]  ;;  %v105_v21 = vsel %vm91_vm0, %v47_v14, 0  ;;  %vm213_vm1 = vcmask 261120  }
   0x8   :  { %v36_v19 = vld [vmem:[%s613_s0 + $0x38] sm:$0xff]  ;;  %v180_v20 = vld [vmem:[%s617_s4 + $0x8] sm:$0xff]  ;;  %v181_v23 = vld [vmem:[%s617_s4 + $0x10] sm:$0xff]  ;;  %v447_v61 = vmov 0.0   ;;  %vm448_vm2 = vmmov 0   ;;  %s449_s9 = smov [#allocation3]  }
   0x9   :  { %68 = vperm.xlu0 %408, %v58_v15   ;;  %v48_v22 = vpack.c.bf16 %v36_v19, %v35_v18  ;;  %v182_v24 = vld [vmem:[%s617_s4 + $0x18] sm:$0xff]  ;;  %v37_v25 = vld [vmem:[%s613_s0 + $0x40] sm:$0xff]  ;;  %v38_v26 = vld [vmem:[%s613_s0 + $0x48] sm:$0xff]  ;;  %v275_v15 = vstv %s619_s6  ;;  %s326_s10 = sshll.u32 %s449_s9, 4  ;;  %s327_s10 = int_to_ptr.vmem [resolvable:$true] %s326_s10 }
   0xa   :  { %78 = vperm.xlu1 %409, %v60_v16   ;;  %v49_v28 = vpack.c.bf16 %v38_v26, %v37_v25  ;;  %v39_v29 = vld [vmem:[%s613_s0 + $0x50] sm:$0xff]  ;;  %v40_v30 = vld [vmem:[%s613_s0 + $0x58] sm:$0xff]  ;;  %v41_v33 = vld [vmem:[%s613_s0 + $0x60] sm:$0xff]  ;;  %s422_s11 = scalar_lea.vmem %s327_s10, 16  ;;  %s426_s12 = scalar_lea.vmem %s327_s10, 32 }
   0xb   :  { %v108_v27 = vsel %vm91_vm0, %v48_v22, 0  ;;  %v50_v32 = vpack.c.bf16 %v40_v30, %v39_v29  ;;  %v42_v34 = vld [vmem:[%s613_s0 + $0x68] sm:$0xff]  ;;  %v43_v37 = vld [vmem:[%s613_s0 + $0x70] sm:$0xff]  ;;  %v44_v38 = vld [vmem:[%s613_s0 + $0x78] sm:$0xff]  ;;  %p423_p0 = scmp.ne.s32.totalorder %s327_s10, %s422_s11  ;;  %p427_p1 = scmp.lt.s32.totalorder %s327_s10, %s327_s10 }
   0xc   :  { %v111_v31 = vsel %vm91_vm0, %v49_v28, 0  ;;  %v51_v36 = vpack.c.bf16 %v42_v34, %v41_v33  ;;  %v52_v40 = vpack.c.bf16 %v44_v38, %v43_v37  ;;  %v411_v42 = vld [vmem:[%s614_s1 + $0x8] sm:$0xff]   ;;  %v412_v43 = vld [vmem:[%s616_s3] sm:$0xff]   ;;  %p428_p2 = scmp.lt.s32.totalorder %s426_s12, %s422_s11 }
   0xd   :  { %363 = vmatpush3.bf16.xpose.msra.mxu0 %v102_v13  ;;  %185 = vperm.xlu0 %408, %v179_v17   ;;  %v114_v35 = vsel %vm91_vm0, %v50_v32, 0  ;;  %v413_v60 = vld [vmem:[%s616_s3 + $0x8] sm:$0xff]  }
   0xe   :  { %398 = vmatprep.subr.msk.bf16.mxu0 %vm91_vm0, %v47_v14  ;;  %190 = vperm.xlu1 %409, %v180_v20   ;;  %v117_v39 = vsel %vm91_vm0, %v51_v36, 0  ;;  %v120_v41 = vsel %vm91_vm0, %v52_v40, 0  ;;  %v273_v14 = vld [vmem:[%s618_s5] sm:$0x1]  ;;  %p429_p3 = por %p428_p2, %p427_p1 }
   0xf   :  { %384 = vmatprep.mubr.msk.bf16.mxu1 %vm213_vm1, %v412_v43 }
  0x10   :  { %p430_p4 = pnand %p429_p3, %p423_p0 }
  0x11   :  { %195 = vperm.xlu0 %408, %v181_v23  }
  0x12   :  { %200 = vperm.xlu1 %409, %v182_v24  }
  0x15   :  { %365 = vmatpush3.bf16.xpose.msra.mxu0 %v105_v21 }
  0x16   :  { %399 = vmatprep.subr.msk.bf16.mxu0 %vm91_vm0, %v48_v22 }
  0x1d   :  { %367 = vmatpush3.bf16.xpose.msra.mxu0 %v108_v27 }
  0x1e   :  { %400 = vmatprep.subr.msk.bf16.mxu0 %vm91_vm0, %v49_v28 }
  0x25   :  { %369 = vmatpush3.bf16.xpose.msra.mxu0 %v111_v31 }
  0x26   :  { %401 = vmatprep.subr.msk.bf16.mxu0 %vm91_vm0, %v50_v32 }
  0x2d   :  { %371 = vmatpush3.bf16.xpose.msra.mxu0 %v114_v35 }
  0x2e   :  { %402 = vmatprep.subr.msk.bf16.mxu0 %vm91_vm0, %v51_v36 }
  0x35   :  { %373 = vmatpush3.bf16.xpose.msra.mxu0 %v117_v39 }
  0x36   :  { %403 = vmatprep.subr.msk.bf16.mxu0 %vm91_vm0, %v52_v40 }
  0x3d   :  { %375 = vmatpush3.bf16.xpose.msra.mxu0 %v120_v41 }
  0x44   :  { %377 = vmatmul.mubr.msk.bf16.vlgmr.msra.gmra.mrb[0].mxu0 %vm91_vm0, %v411_v42 }
  0x84   :  { %v64_v45 = vpop.permute.xlu0 %63 }
  0x85   :  { %v74_v44 = vpop.permute.xlu1 %73 }
  0x88   :  { %v69_v50 = vpop.permute.xlu0 %68 }
  0x89   :  { %v79_v48 = vpop.permute.xlu1 %78 }
  0x8c   :  { %v186_v62 = vpop.permute.xlu0 %185 }
  0x8d   :  { %v191_v63 = vpop.permute.xlu1 %190 }
  0x90   :  { %v196_v1 = vpop.permute.xlu0 %195 }
  0x91   :  { %v201_v3 = vpop.permute.xlu1 %200 }
 0x117   :  { %v378_v46 = vpop.f32.mrb[0].mxu0 }
 0x118   :  { %v156_v47 = vpop.f32.mrb[1].mxu0  ;;  %v165_v51 = vadd.f32 %v378_v46, %v74_v44 }
 0x119   :  { %v379_v49 = vpop.f32.mrb[2].mxu0  ;;  %v157_v54 = vadd.f32 %v156_v47, %v64_v45 }
 0x11a   :  { %v168_v52 = vadd.f32 %v379_v49, %v79_v48  ;;  %v159_v53 = vpop.f32.mrb[3].mxu0 }
 0x11b   :  { %v160_v55 = vadd.f32 %v159_v53, %v69_v50 }
 0x11c   :  { %v172_v56 = vpack.c.bf16 %v168_v52, %v165_v51 }
 0x11d   :  { %v171_v57 = vpack.c.bf16 %v160_v55, %v157_v54 }
 0x11f   :  { %414 = vtanh.bf16 %v171_v57 }
 0x120   :  { %416 = vtanh.bf16 %v172_v56 }
 0x12a   :  { %v415_v58 = vpop.eup %414 }
 0x12b   :  { %380 = vmatprep.subr.bf16.mxu1 %v415_v58  ;;  %v417_v59 = vpop.eup %416 }
 0x12c   :  { %381 = vmatpush3.bf16.msra.mxu1 %v415_v58 }
 0x12d   :  { %382 = vmatprep.subr.bf16.mxu1 %v417_v59 }
 0x130   :  { %383 = vmatpush3.bf16.msra.mxu1 %v417_v59 }
 0x131   :  { %388 = vmatprep.subr.bf16.mxu1 %v447_v61 }
 0x133   :  { %385 = vmatmul.mubr.msk.bf16.vlgmr.msra.gmra.mrb[0].mxu1 %vm213_vm1, %v413_v60 }
 0x134   :  { %392 = vmatprep.mubr.msk.bf16.mxu1 %vm448_vm2, %v447_v61 }
 0x206   :  { %v386_v0 = vpop.f32.mrb[0].mxu1 }
 0x207   :  { %v254_v2 = vpop.f32.mrb[1].mxu1  ;;  %v263_v5 = vadd.f32 %v386_v0, %v196_v1 }
 0x208   :  { %v387_v4 = vpop.f32.mrb[2].mxu1  ;;  %v255_v8 = vadd.f32 %v254_v2, %v186_v62 }
 0x209   :  { %v266_v6 = vadd.f32 %v387_v4, %v201_v3  ;;  %v257_v7 = vpop.f32.mrb[3].mxu1 }
 0x20a   :  { %v258_v9 = vadd.f32 %v257_v7, %v191_v63 }
 0x20b   :  { %v270_v10 = vpack.c.bf16 %v266_v6, %v263_v5 }
 0x20c   :  { %v269_v11 = vpack.c.bf16 %v258_v9, %v255_v8 }
 0x20e   :  { %418 = vtanh.bf16 %v269_v11 }
 0x20f   :  { %420 = vtanh.bf16 %v270_v10 }
 0x219   :  { %v419_v12 = vpop.eup %418 }
 0x21a   :  { %389 = vmatpush3.bf16.msra.mxu1 %v419_v12  ;;  %v421_v13 = vpop.eup %420 }
 0x21b   :  { %390 = vmatprep.subr.bf16.mxu1 %v447_v61 }
 0x21e   :  { %391 = vmatpush3.bf16.msra.mxu1 %v421_v13 }
 0x221   :  { %393 = vmatmul.mubr.msk.bf16.vlgmr.msra.gmra.mrb[4].mxu1 %vm213_vm1, %v273_v14 }
 0x2f4   :  { %v313_v16 = vpop.f32.mrb[4].mxu1 }
 0x2f5   :  { %v314_v17 = vadd.f32 %v313_v16, %v275_v15  ;;  %v394_v18 = vpop.f32.mrb[5].mxu1 }
 0x2f6   :  { %v316_v19 = vpop.f32.mrb[6].mxu1 }
 0x2f7   :  { %319 = vst [vmem:[#allocation3] sm:$0x1] %v314_v17  ;;  %v395_v20 = vpop.f32.mrb[7].mxu1 }
 0x2f8   :  { %433 = shalt.err (!%p430_p4)
}
 0x2f9   :  { %s434_s6 = scalar_lea.hbm %s620_s7, 16 }
 0x2fa   :  { %p435_p5 = scmp.ne.s32.totalorder %s620_s7, %s434_s6  ;;  %p438_p6 = scmp.lt.u32.totalorder %s434_s6, %s620_s7 }
 0x2fc   :  { %p440_p7 = pnand %p438_p6, %p435_p5 }
 0x2fe   :  { %443 = shalt.err (!%p440_p7)
}
 0x2ff   :  { %329 = dma.vmem_to_hbm [thread:$0]  %s327_s10, 16, %s620_s7, [#allocation4]  }
 0x300   :  { %444 = dma.done.wait [#allocation4], 16  }
 0x301   :  { %445 = vsyncadd [#allocation4], 4294967280 }
 0x302   :  { %333 = vsyncpa [#allocation4], 1 }

</bundles_post_ra>
